<compile_context>
chip_gen: v7x
topology: tpu7x:2x2x1
jax: 0.10.0
libtpu: 0.0.40
codegen_flags: <defaults>
</compile_context>

<pallas_src>
import jax
import jax.numpy as jnp
import numpy as np
from jax import lax
from jax.experimental import pallas as pl
from jax.experimental.pallas import tpu as pltpu


# ------------------------------ Pallas kernel --------------------------------

def _full_spec(shape):
    nd = len(shape)
    return pl.BlockSpec(shape, lambda i: (0,) * nd)


def _make_decoder_kernel(n_dense, n_deconv, bn_counts, eps):
    """Fully fused decoder.

    Ref order: x, (dense_w, dense_b)*n_dense,
               (wbig, bias_l, S, E, gamma, beta_l)*n_deconv, out.
      x      : (B, D0) f32
      dense_w: (D_in, D_out) bf16 ; dense_b: (1, D_out) f32
      wbig   : (Cin*H*W, Cout*Ho*Wo) bf16   -- spatially folded deconv weight
      bias_l : (1, Cout*Ho*Wo) f32          -- conv bias repeated per channel block
      S      : (Cout, Cout*Ho*Wo) f32 0/1   -- channel broadcast (per-channel -> lanes)
      E      : (Cout*Ho*Wo, Cout) f32 0/1   -- channel segment-sum (lanes -> per-channel)
      gamma  : (1, Cout) f32
      beta_l : (1, Cout*Ho*Wo) f32
      out    : (B, Cout_last*Ho_last*Wo_last) f32
    """

    def kernel(*refs):
        pos = 0
        x_ref = refs[pos]; pos += 1
        dense_refs = refs[pos:pos + 2 * n_dense]; pos += 2 * n_dense
        deconv_refs = refs[pos:pos + 6 * n_deconv]; pos += 6 * n_deconv
        o_ref = refs[pos]

        # ---- dense stack: (B, D_in) @ (D_in, D_out) + b -> ReLU ----
        h = x_ref[...]                                            # (B, D0) f32
        for li in range(n_dense):
            w = dense_refs[2 * li][...]                           # (Din, Dout) bf16
            b = dense_refs[2 * li + 1][...]                       # (1, Dout) f32
            h = jnp.maximum(
                jnp.dot(h.astype(jnp.bfloat16), w,
                        preferred_element_type=jnp.float32) + b, 0.0)
        # UnFlatten is a no-op in this layout: (B, C0) == (B, C0*1*1).

        # ---- deconv stages: folded matmul -> +bias -> BatchNorm -> act ----
        for si in range(n_deconv):
            wbig = deconv_refs[6 * si + 0][...]                   # (K, R) bf16
            bias_l = deconv_refs[6 * si + 1][...]                 # (1, R) f32
            s_mat = deconv_refs[6 * si + 2][...]                  # (C, R) f32
            e_mat = deconv_refs[6 * si + 3][...]                  # (R, C) f32
            gamma = deconv_refs[6 * si + 4][...]                  # (1, C) f32
            beta_l = deconv_refs[6 * si + 5][...]                 # (1, R) f32

            # ConvTranspose2d: one MXU matmul over (Cin, H, W); bias included.
            y = jnp.dot(h.astype(jnp.bfloat16), wbig,
                        preferred_element_type=jnp.float32) + bias_l    # (B, R) f32

            # BatchNorm2d, training-mode batch statistics, biased variance,
            # two-pass centered form.  Segment matmuls keep everything full-slab.
            n = bn_counts[si]                                     # B * Ho * Wo
            mean_c = jnp.sum(jnp.dot(y, e_mat, preferred_element_type=jnp.float32),
                             axis=0, keepdims=True) / n           # (1, C)
            mean_l = jnp.dot(mean_c, s_mat,
                             preferred_element_type=jnp.float32)  # (1, R)
            cen = y - mean_l
            var_c = jnp.sum(jnp.dot(cen * cen, e_mat,
                                    preferred_element_type=jnp.float32),
                            axis=0, keepdims=True) / n            # (1, C)
            scale_c = gamma * lax.rsqrt(var_c + eps)              # (1, C)
            scale_l = jnp.dot(scale_c, s_mat,
                              preferred_element_type=jnp.float32) # (1, R)
            y = cen * scale_l + beta_l

            h = jnp.maximum(y, 0.0) if si != n_deconv - 1 else jnp.tanh(y)

        o_ref[...] = h.astype(o_ref.dtype)

    return kernel


def cnn_decoder_forward(x, params, eps=1e-5):
    """x: (B, hidden_dims[0]) f32 -> (B, 3, H_out, W_out) f32 (NCHW, like PyTorch)."""
    B = x.shape[0]
    dense, deconv = params["dense"], params["deconv"]

    operands = [x]
    bn_counts = []
    for (w, b) in dense:
        operands += [w, b]
    for st in deconv:
        operands += [st["wbig"], st["bias_l"], st["S"], st["E"],
                     st["gamma"], st["beta_l"]]
        bn_counts.append(float(B * st["Ho"] * st["Wo"]))

    last = deconv[-1]
    out2d_shape = (B, last["Cout"] * last["Ho"] * last["Wo"])

    out2d = pl.pallas_call(
        _make_decoder_kernel(len(dense), len(deconv), tuple(bn_counts), eps),
        grid=(1,),
        in_specs=[_full_spec(op.shape) for op in operands],
        out_specs=_full_spec(out2d_shape),
        out_shape=jax.ShapeDtypeStruct(out2d_shape, jnp.float32),
        compiler_params=pltpu.CompilerParams(
            dimension_semantics=("arbitrary",)),
    )(*operands)

    # Lane index is (c, oh, ow) row-major -> NCHW is a free reshape.
    return out2d.reshape(B, last["Cout"], last["Ho"], last["Wo"])


# --------------------------- deterministic parameters --------------------------

def init_params(key, hidden_dims, channels, kernel_sizes):
    """Raw, PyTorch-layout parameters (also consumed by the pure-JAX reference)."""
    chain = list(channels) + [3]
    raw = {"dense": [], "deconv": [], "bn": []}
    for i in range(len(hidden_dims) - 1):
        key, k1, k2 = jax.random.split(key, 3)
        bound = 1.0 / float(hidden_dims[i]) ** 0.5
        raw["dense"].append((
            jax.random.uniform(k1, (hidden_dims[i], hidden_dims[i + 1]),
                               jnp.float32, -bound, bound),
            jax.random.uniform(k2, (hidden_dims[i + 1],), jnp.float32, -bound, bound)))
    for i in range(len(chain) - 1):
        cin, cout, k = chain[i], chain[i + 1], kernel_sizes[i]
        key, k1, k2, k3, k4 = jax.random.split(key, 5)
        bound = 1.0 / float(cin * k * k) ** 0.5
        raw["deconv"].append((
            jax.random.uniform(k1, (cin, cout, k, k), jnp.float32, -bound, bound),
            jax.random.uniform(k2, (cout,), jnp.float32, -bound, bound)))
        raw["bn"].append((
            jax.random.uniform(k3, (cout,), jnp.float32, 0.5, 1.5),
            0.1 * jax.random.normal(k4, (cout,), jnp.float32)))
    return raw


def prepare_params(raw, strides):
    """One-time weight preprocessing for the fused kernel.

    - dense weights (D_in, D_out) bf16, biases (1, D_out) f32
    - deconv weights spatially folded: (Cin*H*W, Cout*Ho*Wo) bf16
      wbig[(ci,ih,iw),(co,oh,ow)] = W[ci,co,oh-ih*s,ow-iw*s] (zero outside the tap)
    - conv bias / BN beta repeated per channel block into (1, R) lane rows
    - S (C, R) / E (R, C) 0/1 segment matrices for per-channel BN stats / broadcast
    """
    prep = {"dense": [], "deconv": []}
    for (w, b) in raw["dense"]:
        prep["dense"].append((jnp.asarray(w, jnp.bfloat16),
                              jnp.asarray(b, jnp.float32).reshape(1, -1)))
    H = W = 1                                    # UnFlatten -> 1x1 spatial
    for i, ((w, bias), (gamma, beta)) in enumerate(zip(raw["deconv"], raw["bn"])):
        wnp = np.asarray(w, np.float32)
        cin, cout, k, _ = wnp.shape
        s = strides[i]
        Ho, Wo = (H - 1) * s + k, (W - 1) * s + k
        wb = np.zeros((cin, H, W, cout, Ho, Wo), np.float32)
        for ih in range(H):
            for iw in range(W):
                wb[:, ih, iw, :, ih * s:ih * s + k, iw * s:iw * s + k] = wnp
        hw = Ho * Wo
        R = cout * hw
        seg = np.zeros((cout, R), np.float32)
        for c in range(cout):
            seg[c, c * hw:(c + 1) * hw] = 1.0
        prep["deconv"].append(dict(
            wbig=jnp.asarray(wb.reshape(cin * H * W, R), jnp.bfloat16),
            bias_l=jnp.asarray(np.repeat(np.asarray(bias, np.float32), hw)[None, :]),
            S=jnp.asarray(seg),
            E=jnp.asarray(seg.T.copy()),
            gamma=jnp.asarray(gamma, jnp.float32).reshape(1, -1),
            beta_l=jnp.asarray(np.repeat(np.asarray(beta, np.float32), hw)[None, :]),
            Cout=cout, Ho=Ho, Wo=Wo))
        H, W = Ho, Wo
    return prep


# ------------------------------ pure-JAX reference -----------------------------

def reference_forward(x, raw, kernel_sizes, strides, eps=1e-5, cast_bf16=False):
    """Reference of the PyTorch module (training-mode BatchNorm2d, biased variance).

    cast_bf16=True mimics the kernel's quantization points (bf16 matmul/conv operands,
    f32 accumulation) so the Pallas output can be checked tightly; False is pure f32.
    """
    def c(v):
        return v.astype(jnp.bfloat16) if cast_bf16 else v

    h = x
    for (w, b) in raw["dense"]:
        h = jnp.maximum(jnp.dot(c(h), c(w), preferred_element_type=jnp.float32)
                        + b.reshape(1, -1), 0.0)
    h = h.reshape(h.shape[0], 1, 1, h.shape[1])          # UnFlatten (NHWC, 1x1 spatial)
    n = len(raw["deconv"])
    for i, ((w, b), (gamma, beta)) in enumerate(zip(raw["deconv"], raw["bn"])):
        k, s = kernel_sizes[i], strides[i]
        rhs = jnp.flip(w, axis=(2, 3)).transpose(2, 3, 0, 1)   # HWIO
        y = lax.conv_general_dilated(
            c(h), c(rhs), window_strides=(1, 1),
            padding=[(k - 1, k - 1), (k - 1, k - 1)],
            lhs_dilation=(s, s),
            dimension_numbers=("NHWC", "HWIO", "NHWC"),
            preferred_element_type=jnp.float32)
        y = y + b.reshape(1, 1, 1, -1)
        mean = jnp.mean(y, axis=(0, 1, 2), keepdims=True)
        var = jnp.mean((y - mean) ** 2, axis=(0, 1, 2), keepdims=True)
        y = (y - mean) * lax.rsqrt(var + eps)
        y = y * gamma.reshape(1, 1, 1, -1) + beta.reshape(1, 1, 1, -1)
        h = jnp.maximum(y, 0.0) if i != n - 1 else jnp.tanh(y)
    return h.transpose(0, 3, 1, 2)


# ----------------------------------- main --------------------------------------

if __name__ == "__main__":
    hidden_dims = [32, 16, 8]     # dense stack 32 -> 16 -> 8
    channels = [8, 4]             # deconv chain 8 -> 4 -> 3
    kernel_sizes = [3, 3]
    strides = [2, 2]
    assert hidden_dims[-1] == channels[0]   # UnFlatten feeds the first deconv

    key = jax.random.PRNGKey(0)
    key, pkey, xkey = jax.random.split(key, 3)
    raw = init_params(pkey, hidden_dims, channels, kernel_sizes)
    params = prepare_params(raw, strides)
    x = jax.random.normal(xkey, (2, hidden_dims[0]), jnp.float32)

    out = jax.block_until_ready(cnn_decoder_forward(x, params))
    assert out.shape == (2, 3, 7, 7), out.shape

    # Tight check vs a reference with the same bf16 quantization points (tolerance
    # absorbs bf16-rounding / summation-order effects through two BatchNorms), plus
    # a loose sanity check vs the pure-f32 reference bounding the total bf16 error.
    ref_bf16 = reference_forward(x, raw, kernel_sizes, strides, cast_bf16=True)
    ref_f32 = reference_forward(x, raw, kernel_sizes, strides, cast_bf16=False)
    err_bf16 = float(jnp.max(jnp.abs(out - ref_bf16)))
    err_f32 = float(jnp.max(jnp.abs(out - ref_f32)))
    assert jnp.allclose(out, ref_bf16, atol=3e-2, rtol=3e-2), err_bf16
    assert jnp.allclose(out, ref_f32, atol=1e-1, rtol=1e-1), err_f32
    print("KERNEL_OK")
</pallas_src>

<mosaic_0001>
module attributes {stable_mosaic.version = 11 : i64} {
  func.func @kernel(%arg0: i32, %arg1: memref<2x32xf32, #tpu.memory_space<vmem>>, %arg2: memref<32x16xbf16, #tpu.memory_space<vmem>>, %arg3: memref<1x16xf32, #tpu.memory_space<vmem>>, %arg4: memref<16x8xbf16, #tpu.memory_space<vmem>>, %arg5: memref<1x8xf32, #tpu.memory_space<vmem>>, %arg6: memref<8x36xbf16, #tpu.memory_space<vmem>>, %arg7: memref<1x36xf32, #tpu.memory_space<vmem>>, %arg8: memref<4x36xf32, #tpu.memory_space<vmem>>, %arg9: memref<36x4xf32, #tpu.memory_space<vmem>>, %arg10: memref<1x4xf32, #tpu.memory_space<vmem>>, %arg11: memref<1x36xf32, #tpu.memory_space<vmem>>, %arg12: memref<36x147xbf16, #tpu.memory_space<vmem>>, %arg13: memref<1x147xf32, #tpu.memory_space<vmem>>, %arg14: memref<3x147xf32, #tpu.memory_space<vmem>>, %arg15: memref<147x3xf32, #tpu.memory_space<vmem>>, %arg16: memref<1x3xf32, #tpu.memory_space<vmem>>, %arg17: memref<1x147xf32, #tpu.memory_space<vmem>>, %arg18: memref<2x147xf32, #tpu.memory_space<vmem>>) attributes {dimension_semantics = [#tpu.dimension_semantics<arbitrary>], iteration_bounds = array<i64: 1>, scalar_prefetch = 0 : i64, scratch_operands = 0 : i64, tpu.core_type = #tpu.core_type<tc>, window_params = [{pipeline_mode = #tpu.pipeline_mode<synchronous>, transform_indices = @transform_0, window_bounds = array<i64: 2, 32>}, {pipeline_mode = #tpu.pipeline_mode<synchronous>, transform_indices = @transform_1, window_bounds = array<i64: 32, 16>}, {pipeline_mode = #tpu.pipeline_mode<synchronous>, transform_indices = @transform_2, window_bounds = array<i64: 1, 16>}, {pipeline_mode = #tpu.pipeline_mode<synchronous>, transform_indices = @transform_3, window_bounds = array<i64: 16, 8>}, {pipeline_mode = #tpu.pipeline_mode<synchronous>, transform_indices = @transform_4, window_bounds = array<i64: 1, 8>}, {pipeline_mode = #tpu.pipeline_mode<synchronous>, transform_indices = @transform_5, window_bounds = array<i64: 8, 36>}, {pipeline_mode = #tpu.pipeline_mode<synchronous>, transform_indices = @transform_6, window_bounds = array<i64: 1, 36>}, {pipeline_mode = #tpu.pipeline_mode<synchronous>, transform_indices = @transform_7, window_bounds = array<i64: 4, 36>}, {pipeline_mode = #tpu.pipeline_mode<synchronous>, transform_indices = @transform_8, window_bounds = array<i64: 36, 4>}, {pipeline_mode = #tpu.pipeline_mode<synchronous>, transform_indices = @transform_9, window_bounds = array<i64: 1, 4>}, {pipeline_mode = #tpu.pipeline_mode<synchronous>, transform_indices = @transform_10, window_bounds = array<i64: 1, 36>}, {pipeline_mode = #tpu.pipeline_mode<synchronous>, transform_indices = @transform_11, window_bounds = array<i64: 36, 147>}, {pipeline_mode = #tpu.pipeline_mode<synchronous>, transform_indices = @transform_12, window_bounds = array<i64: 1, 147>}, {pipeline_mode = #tpu.pipeline_mode<synchronous>, transform_indices = @transform_13, window_bounds = array<i64: 3, 147>}, {pipeline_mode = #tpu.pipeline_mode<synchronous>, transform_indices = @transform_14, window_bounds = array<i64: 147, 3>}, {pipeline_mode = #tpu.pipeline_mode<synchronous>, transform_indices = @transform_15, window_bounds = array<i64: 1, 3>}, {pipeline_mode = #tpu.pipeline_mode<synchronous>, transform_indices = @transform_16, window_bounds = array<i64: 1, 147>}, {pipeline_mode = #tpu.pipeline_mode<synchronous>, transform_indices = @transform_17, window_bounds = array<i64: 2, 147>}]} {
    %c0 = arith.constant 0 : index
    %c0_0 = arith.constant 0 : index
    %0 = vector.load %arg1[%c0, %c0_0] : memref<2x32xf32, #tpu.memory_space<vmem>>, vector<2x32xf32>
    %c0_1 = arith.constant 0 : index
    %c0_2 = arith.constant 0 : index
    %1 = vector.load %arg2[%c0_1, %c0_2] : memref<32x16xbf16, #tpu.memory_space<vmem>>, vector<32x16xbf16>
    %c0_3 = arith.constant 0 : index
    %c0_4 = arith.constant 0 : index
    %2 = vector.load %arg3[%c0_3, %c0_4] : memref<1x16xf32, #tpu.memory_space<vmem>>, vector<1x16xf32>
    %3 = arith.truncf %0 : vector<2x32xf32> to vector<2x32xbf16>
    %cst = arith.constant dense<0.000000e+00> : vector<2x16xf32>
    %4 = tpu.matmul %3, %1, %cst {dimension_numbers = #tpu.dot_dimension_numbers<[1], [0], [0], [1], [0, 0, 1, 1], [], []>} : vector<2x32xbf16>, vector<32x16xbf16>, vector<2x16xf32> -> vector<2x16xf32>
    %5 = vector.broadcast %2 : vector<1x16xf32> to vector<2x16xf32>
    %6 = arith.addf %4, %5 : vector<2x16xf32>
    %cst_5 = arith.constant 0.000000e+00 : f32
    %7 = vector.broadcast %cst_5 : f32 to vector<2x16xf32>
    %8 = arith.maximumf %6, %7 : vector<2x16xf32>
    %c0_6 = arith.constant 0 : index
    %c0_7 = arith.constant 0 : index
    %9 = vector.load %arg4[%c0_6, %c0_7] : memref<16x8xbf16, #tpu.memory_space<vmem>>, vector<16x8xbf16>
    %c0_8 = arith.constant 0 : index
    %c0_9 = arith.constant 0 : index
    %10 = vector.load %arg5[%c0_8, %c0_9] : memref<1x8xf32, #tpu.memory_space<vmem>>, vector<1x8xf32>
    %11 = arith.truncf %8 : vector<2x16xf32> to vector<2x16xbf16>
    %cst_10 = arith.constant dense<0.000000e+00> : vector<2x8xf32>
    %12 = tpu.matmul %11, %9, %cst_10 {dimension_numbers = #tpu.dot_dimension_numbers<[1], [0], [0], [1], [0, 0, 1, 1], [], []>} : vector<2x16xbf16>, vector<16x8xbf16>, vector<2x8xf32> -> vector<2x8xf32>
    %13 = vector.broadcast %10 : vector<1x8xf32> to vector<2x8xf32>
    %14 = arith.addf %12, %13 : vector<2x8xf32>
    %cst_11 = arith.constant 0.000000e+00 : f32
    %15 = vector.broadcast %cst_11 : f32 to vector<2x8xf32>
    %16 = arith.maximumf %14, %15 : vector<2x8xf32>
    %c0_12 = arith.constant 0 : index
    %c0_13 = arith.constant 0 : index
    %17 = vector.load %arg6[%c0_12, %c0_13] : memref<8x36xbf16, #tpu.memory_space<vmem>>, vector<8x36xbf16>
    %c0_14 = arith.constant 0 : index
    %c0_15 = arith.constant 0 : index
    %18 = vector.load %arg7[%c0_14, %c0_15] : memref<1x36xf32, #tpu.memory_space<vmem>>, vector<1x36xf32>
    %c0_16 = arith.constant 0 : index
    %c0_17 = arith.constant 0 : index
    %19 = vector.load %arg8[%c0_16, %c0_17] : memref<4x36xf32, #tpu.memory_space<vmem>>, vector<4x36xf32>
    %c0_18 = arith.constant 0 : index
    %c0_19 = arith.constant 0 : index
    %20 = vector.load %arg9[%c0_18, %c0_19] : memref<36x4xf32, #tpu.memory_space<vmem>>, vector<36x4xf32>
    %c0_20 = arith.constant 0 : index
    %c0_21 = arith.constant 0 : index
    %21 = vector.load %arg10[%c0_20, %c0_21] : memref<1x4xf32, #tpu.memory_space<vmem>>, vector<1x4xf32>
    %c0_22 = arith.constant 0 : index
    %c0_23 = arith.constant 0 : index
    %22 = vector.load %arg11[%c0_22, %c0_23] : memref<1x36xf32, #tpu.memory_space<vmem>>, vector<1x36xf32>
    %23 = arith.truncf %16 : vector<2x8xf32> to vector<2x8xbf16>
    %cst_24 = arith.constant dense<0.000000e+00> : vector<2x36xf32>
    %24 = tpu.matmul %23, %17, %cst_24 {dimension_numbers = #tpu.dot_dimension_numbers<[1], [0], [0], [1], [0, 0, 1, 1], [], []>} : vector<2x8xbf16>, vector<8x36xbf16>, vector<2x36xf32> -> vector<2x36xf32>
    %25 = vector.broadcast %18 : vector<1x36xf32> to vector<2x36xf32>
    %26 = arith.addf %24, %25 : vector<2x36xf32>
    %cst_25 = arith.constant dense<0.000000e+00> : vector<2x4xf32>
    %27 = tpu.matmul %26, %20, %cst_25 {dimension_numbers = #tpu.dot_dimension_numbers<[1], [0], [0], [1], [0, 0, 1, 1], [], []>} : vector<2x36xf32>, vector<36x4xf32>, vector<2x4xf32> -> vector<2x4xf32>
    %cst_26 = arith.constant dense<0.000000e+00> : vector<4xf32>
    %28 = vector.multi_reduction <add>, %27, %cst_26 [0] : vector<2x4xf32> to vector<4xf32>
    %29 = vector.shape_cast %28 : vector<4xf32> to vector<1x4xf32>
    %cst_27 = arith.constant 1.800000e+01 : f32
    %30 = vector.broadcast %cst_27 : f32 to vector<1x4xf32>
    %31 = arith.divf %29, %30 : vector<1x4xf32>
    %cst_28 = arith.constant dense<0.000000e+00> : vector<1x36xf32>
    %32 = tpu.matmul %31, %19, %cst_28 {dimension_numbers = #tpu.dot_dimension_numbers<[1], [0], [0], [1], [0, 0, 1, 1], [], []>} : vector<1x4xf32>, vector<4x36xf32>, vector<1x36xf32> -> vector<1x36xf32>
    %33 = vector.broadcast %32 : vector<1x36xf32> to vector<2x36xf32>
    %34 = arith.subf %26, %33 : vector<2x36xf32>
    %35 = arith.mulf %34, %34 : vector<2x36xf32>
    %cst_29 = arith.constant dense<0.000000e+00> : vector<2x4xf32>
    %36 = tpu.matmul %35, %20, %cst_29 {dimension_numbers = #tpu.dot_dimension_numbers<[1], [0], [0], [1], [0, 0, 1, 1], [], []>} : vector<2x36xf32>, vector<36x4xf32>, vector<2x4xf32> -> vector<2x4xf32>
    %cst_30 = arith.constant dense<0.000000e+00> : vector<4xf32>
    %37 = vector.multi_reduction <add>, %36, %cst_30 [0] : vector<2x4xf32> to vector<4xf32>
    %38 = vector.shape_cast %37 : vector<4xf32> to vector<1x4xf32>
    %cst_31 = arith.constant 1.800000e+01 : f32
    %39 = vector.broadcast %cst_31 : f32 to vector<1x4xf32>
    %40 = arith.divf %38, %39 : vector<1x4xf32>
    %cst_32 = arith.constant 9.99999974E-6 : f32
    %41 = vector.broadcast %cst_32 : f32 to vector<1x4xf32>
    %42 = arith.addf %40, %41 : vector<1x4xf32>
    %43 = math.rsqrt %42 : vector<1x4xf32>
    %44 = arith.mulf %21, %43 : vector<1x4xf32>
    %cst_33 = arith.constant dense<0.000000e+00> : vector<1x36xf32>
    %45 = tpu.matmul %44, %19, %cst_33 {dimension_numbers = #tpu.dot_dimension_numbers<[1], [0], [0], [1], [0, 0, 1, 1], [], []>} : vector<1x4xf32>, vector<4x36xf32>, vector<1x36xf32> -> vector<1x36xf32>
    %46 = vector.broadcast %45 : vector<1x36xf32> to vector<2x36xf32>
    %47 = arith.mulf %34, %46 : vector<2x36xf32>
    %48 = vector.broadcast %22 : vector<1x36xf32> to vector<2x36xf32>
    %49 = arith.addf %47, %48 : vector<2x36xf32>
    %cst_34 = arith.constant 0.000000e+00 : f32
    %50 = vector.broadcast %cst_34 : f32 to vector<2x36xf32>
    %51 = arith.maximumf %49, %50 : vector<2x36xf32>
    %c0_35 = arith.constant 0 : index
    %c0_36 = arith.constant 0 : index
    %52 = vector.load %arg12[%c0_35, %c0_36] : memref<36x147xbf16, #tpu.memory_space<vmem>>, vector<36x147xbf16>
    %c0_37 = arith.constant 0 : index
    %c0_38 = arith.constant 0 : index
    %53 = vector.load %arg13[%c0_37, %c0_38] : memref<1x147xf32, #tpu.memory_space<vmem>>, vector<1x147xf32>
    %c0_39 = arith.constant 0 : index
    %c0_40 = arith.constant 0 : index
    %54 = vector.load %arg14[%c0_39, %c0_40] : memref<3x147xf32, #tpu.memory_space<vmem>>, vector<3x147xf32>
    %c0_41 = arith.constant 0 : index
    %c0_42 = arith.constant 0 : index
    %55 = vector.load %arg15[%c0_41, %c0_42] : memref<147x3xf32, #tpu.memory_space<vmem>>, vector<147x3xf32>
    %c0_43 = arith.constant 0 : index
    %c0_44 = arith.constant 0 : index
    %56 = vector.load %arg16[%c0_43, %c0_44] : memref<1x3xf32, #tpu.memory_space<vmem>>, vector<1x3xf32>
    %c0_45 = arith.constant 0 : index
    %c0_46 = arith.constant 0 : index
    %57 = vector.load %arg17[%c0_45, %c0_46] : memref<1x147xf32, #tpu.memory_space<vmem>>, vector<1x147xf32>
    %58 = arith.truncf %51 : vector<2x36xf32> to vector<2x36xbf16>
    %cst_47 = arith.constant dense<0.000000e+00> : vector<2x147xf32>
    %59 = tpu.matmul %58, %52, %cst_47 {dimension_numbers = #tpu.dot_dimension_numbers<[1], [0], [0], [1], [0, 0, 1, 1], [], []>} : vector<2x36xbf16>, vector<36x147xbf16>, vector<2x147xf32> -> vector<2x147xf32>
    %60 = vector.broadcast %53 : vector<1x147xf32> to vector<2x147xf32>
    %61 = arith.addf %59, %60 : vector<2x147xf32>
    %cst_48 = arith.constant dense<0.000000e+00> : vector<2x3xf32>
    %62 = tpu.matmul %61, %55, %cst_48 {dimension_numbers = #tpu.dot_dimension_numbers<[1], [0], [0], [1], [0, 0, 1, 1], [], []>} : vector<2x147xf32>, vector<147x3xf32>, vector<2x3xf32> -> vector<2x3xf32>
    %cst_49 = arith.constant dense<0.000000e+00> : vector<3xf32>
    %63 = vector.multi_reduction <add>, %62, %cst_49 [0] : vector<2x3xf32> to vector<3xf32>
    %64 = vector.shape_cast %63 : vector<3xf32> to vector<1x3xf32>
    %cst_50 = arith.constant 9.800000e+01 : f32
    %65 = vector.broadcast %cst_50 : f32 to vector<1x3xf32>
    %66 = arith.divf %64, %65 : vector<1x3xf32>
    %cst_51 = arith.constant dense<0.000000e+00> : vector<1x147xf32>
    %67 = tpu.matmul %66, %54, %cst_51 {dimension_numbers = #tpu.dot_dimension_numbers<[1], [0], [0], [1], [0, 0, 1, 1], [], []>} : vector<1x3xf32>, vector<3x147xf32>, vector<1x147xf32> -> vector<1x147xf32>
    %68 = vector.broadcast %67 : vector<1x147xf32> to vector<2x147xf32>
    %69 = arith.subf %61, %68 : vector<2x147xf32>
    %70 = arith.mulf %69, %69 : vector<2x147xf32>
    %cst_52 = arith.constant dense<0.000000e+00> : vector<2x3xf32>
    %71 = tpu.matmul %70, %55, %cst_52 {dimension_numbers = #tpu.dot_dimension_numbers<[1], [0], [0], [1], [0, 0, 1, 1], [], []>} : vector<2x147xf32>, vector<147x3xf32>, vector<2x3xf32> -> vector<2x3xf32>
    %cst_53 = arith.constant dense<0.000000e+00> : vector<3xf32>
    %72 = vector.multi_reduction <add>, %71, %cst_53 [0] : vector<2x3xf32> to vector<3xf32>
    %73 = vector.shape_cast %72 : vector<3xf32> to vector<1x3xf32>
    %cst_54 = arith.constant 9.800000e+01 : f32
    %74 = vector.broadcast %cst_54 : f32 to vector<1x3xf32>
    %75 = arith.divf %73, %74 : vector<1x3xf32>
    %cst_55 = arith.constant 9.99999974E-6 : f32
    %76 = vector.broadcast %cst_55 : f32 to vector<1x3xf32>
    %77 = arith.addf %75, %76 : vector<1x3xf32>
    %78 = math.rsqrt %77 : vector<1x3xf32>
    %79 = arith.mulf %56, %78 : vector<1x3xf32>
    %cst_56 = arith.constant dense<0.000000e+00> : vector<1x147xf32>
    %80 = tpu.matmul %79, %54, %cst_56 {dimension_numbers = #tpu.dot_dimension_numbers<[1], [0], [0], [1], [0, 0, 1, 1], [], []>} : vector<1x3xf32>, vector<3x147xf32>, vector<1x147xf32> -> vector<1x147xf32>
    %81 = vector.broadcast %80 : vector<1x147xf32> to vector<2x147xf32>
    %82 = arith.mulf %69, %81 : vector<2x147xf32>
    %83 = vector.broadcast %57 : vector<1x147xf32> to vector<2x147xf32>
    %84 = arith.addf %82, %83 : vector<2x147xf32>
    %85 = math.tanh %84 : vector<2x147xf32>
    %c0_57 = arith.constant 0 : index
    %c0_58 = arith.constant 0 : index
    %86 = vector.load %arg18[%c0_57, %c0_58] : memref<2x147xf32, #tpu.memory_space<vmem>>, vector<2x147xf32>
    tpu.vector_store %arg18[%c0_57, %c0_58], %85 {strides = array<i32>} : memref<2x147xf32, #tpu.memory_space<vmem>>, vector<2x147xf32>,
    return
  }
  func.func @transform_0(%arg0: i32) -> (i32, i32) {
    %c0_i32 = arith.constant 0 : i32
    %c0_i32_0 = arith.constant 0 : i32
    %c0_i32_1 = arith.constant 0 : i32
    return %c0_i32, %c0_i32_0 : i32, i32
  }
  func.func @transform_1(%arg0: i32) -> (i32, i32) {
    %c0_i32 = arith.constant 0 : i32
    %c0_i32_0 = arith.constant 0 : i32
    %c0_i32_1 = arith.constant 0 : i32
    return %c0_i32, %c0_i32_0 : i32, i32
  }
  func.func @transform_2(%arg0: i32) -> (i32, i32) {
    %c0_i32 = arith.constant 0 : i32
    %c0_i32_0 = arith.constant 0 : i32
    %c0_i32_1 = arith.constant 0 : i32
    return %c0_i32, %c0_i32_0 : i32, i32
  }
  func.func @transform_3(%arg0: i32) -> (i32, i32) {
    %c0_i32 = arith.constant 0 : i32
    %c0_i32_0 = arith.constant 0 : i32
    %c0_i32_1 = arith.constant 0 : i32
    return %c0_i32, %c0_i32_0 : i32, i32
  }
  func.func @transform_4(%arg0: i32) -> (i32, i32) {
    %c0_i32 = arith.constant 0 : i32
    %c0_i32_0 = arith.constant 0 : i32
    %c0_i32_1 = arith.constant 0 : i32
    return %c0_i32, %c0_i32_0 : i32, i32
  }
  func.func @transform_5(%arg0: i32) -> (i32, i32) {
    %c0_i32 = arith.constant 0 : i32
    %c0_i32_0 = arith.constant 0 : i32
    %c0_i32_1 = arith.constant 0 : i32
    return %c0_i32, %c0_i32_0 : i32, i32
  }
  func.func @transform_6(%arg0: i32) -> (i32, i32) {
    %c0_i32 = arith.constant 0 : i32
    %c0_i32_0 = arith.constant 0 : i32
    %c0_i32_1 = arith.constant 0 : i32
    return %c0_i32, %c0_i32_0 : i32, i32
  }
  func.func @transform_7(%arg0: i32) -> (i32, i32) {
    %c0_i32 = arith.constant 0 : i32
    %c0_i32_0 = arith.constant 0 : i32
    %c0_i32_1 = arith.constant 0 : i32
    return %c0_i32, %c0_i32_0 : i32, i32
  }
  func.func @transform_8(%arg0: i32) -> (i32, i32) {
    %c0_i32 = arith.constant 0 : i32
    %c0_i32_0 = arith.constant 0 : i32
    %c0_i32_1 = arith.constant 0 : i32
    return %c0_i32, %c0_i32_0 : i32, i32
  }
  func.func @transform_9(%arg0: i32) -> (i32, i32) {
    %c0_i32 = arith.constant 0 : i32
    %c0_i32_0 = arith.constant 0 : i32
    %c0_i32_1 = arith.constant 0 : i32
    return %c0_i32, %c0_i32_0 : i32, i32
  }
  func.func @transform_10(%arg0: i32) -> (i32, i32) {
    %c0_i32 = arith.constant 0 : i32
    %c0_i32_0 = arith.constant 0 : i32
    %c0_i32_1 = arith.constant 0 : i32
    return %c0_i32, %c0_i32_0 : i32, i32
  }
  func.func @transform_11(%arg0: i32) -> (i32, i32) {
    %c0_i32 = arith.constant 0 : i32
    %c0_i32_0 = arith.constant 0 : i32
    %c0_i32_1 = arith.constant 0 : i32
    return %c0_i32, %c0_i32_0 : i32, i32
  }
  func.func @transform_12(%arg0: i32) -> (i32, i32) {
    %c0_i32 = arith.constant 0 : i32
    %c0_i32_0 = arith.constant 0 : i32
    %c0_i32_1 = arith.constant 0 : i32
    return %c0_i32, %c0_i32_0 : i32, i32
  }
  func.func @transform_13(%arg0: i32) -> (i32, i32) {
    %c0_i32 = arith.constant 0 : i32
    %c0_i32_0 = arith.constant 0 : i32
    %c0_i32_1 = arith.constant 0 : i32
    return %c0_i32, %c0_i32_0 : i32, i32
  }
  func.func @transform_14(%arg0: i32) -> (i32, i32) {
    %c0_i32 = arith.constant 0 : i32
    %c0_i32_0 = arith.constant 0 : i32
    %c0_i32_1 = arith.constant 0 : i32
    return %c0_i32, %c0_i32_0 : i32, i32
  }
  func.func @transform_15(%arg0: i32) -> (i32, i32) {
    %c0_i32 = arith.constant 0 : i32
    %c0_i32_0 = arith.constant 0 : i32
    %c0_i32_1 = arith.constant 0 : i32
    return %c0_i32, %c0_i32_0 : i32, i32
  }
  func.func @transform_16(%arg0: i32) -> (i32, i32) {
    %c0_i32 = arith.constant 0 : i32
    %c0_i32_0 = arith.constant 0 : i32
    %c0_i32_1 = arith.constant 0 : i32
    return %c0_i32, %c0_i32_0 : i32, i32
  }
  func.func @transform_17(%arg0: i32) -> (i32, i32) {
    %c0_i32 = arith.constant 0 : i32
    %c0_i32_0 = arith.constant 0 : i32
    %c0_i32_1 = arith.constant 0 : i32
    return %c0_i32, %c0_i32_0 : i32, i32
  }
}

</mosaic_0001>

<bundles_post_ra>
// kernel: tpu_custom_call.1
= control target key start
LH: loop header
LB: loop body
LE: loop exit
PB: predicated region body
PF: predicated region fallthrough
CT: control target
= control target key end

     0   :  { %s1672_s0 = inlined_call_operand.vmem [shape: f32[2,32], index: 0, kind: input, shape index: {}]   ;;  %s1673_s1 = inlined_call_operand.vmem [shape: bf16[32,16], index: 1, kind: input, shape index: {}]   ;;  %s1674_s2 = inlined_call_operand.vmem [shape: f32[1,16], index: 2, kind: input, shape index: {}]   ;;  %s1675_s3 = inlined_call_operand.vmem [shape: bf16[16,8], index: 3, kind: input, shape index: {}]   ;;  %s1676_s4 = inlined_call_operand.vmem [shape: f32[1,8], index: 4, kind: input, shape index: {}]   ;;  %s1677_s5 = inlined_call_operand.vmem [shape: bf16[8,36], index: 5, kind: input, shape index: {}]   ;;  %s1678_s6 = inlined_call_operand.vmem [shape: f32[1,36], index: 6, kind: input, shape index: {}]   ;;  %s1679_s7 = inlined_call_operand.vmem [shape: f32[4,36], index: 7, kind: input, shape index: {}]   ;;  %s1680_s8 = inlined_call_operand.vmem [shape: f32[36,4], index: 8, kind: input, shape index: {}]   ;;  %s1681_s9 = inlined_call_operand.vmem [shape: f32[1,4], index: 9, kind: input, shape index: {}]   ;;  %s1682_s10 = inlined_call_operand.vmem [shape: f32[1,36], index: 10, kind: input, shape index: {}]   ;;  %s1683_s11 = inlined_call_operand.vmem [shape: bf16[36,147], index: 11, kind: input, shape index: {}]   ;;  %s1684_s12 = inlined_call_operand.vmem [shape: f32[1,147], index: 12, kind: input, shape index: {}]   ;;  %s1685_s13 = inlined_call_operand.vmem [shape: f32[3,147], index: 13, kind: input, shape index: {}]   ;;  %s1686_s14 = inlined_call_operand.vmem [shape: f32[147,3], index: 14, kind: input, shape index: {}]   ;;  %s1687_s15 = inlined_call_operand.vmem [shape: f32[1,3], index: 15, kind: input, shape index: {}]   ;;  %s1688_s16 = inlined_call_operand.vmem [shape: f32[1,147], index: 16, kind: input, shape index: {}]   ;;  %s1689_s17 = inlined_call_operand.hbm [shape: f32[2,147], index: 17, kind: output, shape index: {}]  }
   0x1   :  { %1691 = sst [smem:[#allocation5_spill]] %s1672_s0 }
   0x2   :  { %1692 = sst [smem:[#allocation6_spill]] %s1673_s1 }
   0x3   :  { %s1693_s26 = sld [smem:[#allocation6_spill]]  ;;  %v1333_v1 = vmov 0.0   ;;  %vm1334_vm0 = vmmov 0   ;;  %s1694_s30 = sld [smem:[#allocation5_spill]] }
   0x4   :  { %1161 = vmatprep.subr.bf16.mxu0 %v1333_v1  ;;  %1169 = vmatprep.subr.bf16.mxu1 %v1333_v1 }
   0x5   :  { %1165 = vmatprep.mubr.msk.bf16.mxu0 %vm1334_vm0, %v1333_v1  ;;  %1171 = vmatprep.mubr.msk.bf16.mxu1 %vm1334_vm0, %v1333_v1 }
   0x9   :  { %v1289_v0 = vld [vmem:[%s1693_s26] sm:$0xff]   ;;  %v1290_v2 = vld [vmem:[%s1693_s26 + $0x8] sm:$0xff]  }
   0xa   :  { %1162 = vmatpush3.bf16.msra.mxu0 %v1289_v0  ;;  %v58_v3 = vld [vmem:[%s1694_s30] sm:$0x3] }
   0xb   :  { %1163 = vmatprep.subr.bf16.mxu0 %v1333_v1 }
   0xc   :  { %22 = vsyncpa [#allocation3], 0  ;;  %v64_v4 = vpack.c.bf16 %v58_v3, %v58_v3  ;;  %vm83_vm1 = vcmask 261120   ;;  %v1291_v5 = vld [vmem:[%s1675_s3] sm:$0xff]   ;;  %vm210_vm2 = vcmask 1043456   ;;  %vm144_vm3 = vcmask 130048  }
   0xd   :  { %1170 = vmatpush3.bf16.msra.mxu1 %v1291_v5  ;;  %v1102_v6 = vld [vmem:[%s1674_s2] ss:$0 sm:$0xff]  ;;  %v193_v17 = vld [vmem:[%s1680_s8 + $0x8] sm:$0xff]  ;;  %v194_v18 = vld [vmem:[%s1680_s8 + $0x10] sm:$0xff]  ;;  %v1335_v19 = vmov 0.0|0.0   ;;  %vm206_vm4 = vcmask 64512   ;;  %v418_v49 = vlaneseq }
   0xe   :  { %1164 = vmatpush3.bf16.msra.mxu0 %v1290_v2  ;;  %1175 = vmatprep.subr.bf16.mxu1 %v1333_v1  ;;  %v189_v11 = vld [vmem:[%s1677_s5] sm:$0xf]  ;;  %v195_v21 = vld [vmem:[%s1680_s8 + $0x18] sm:$0xff]  ;;  %vm254_vm5 = vcmask 293888   ;;  %vm331_vm6 = vcmask 25600   ;;  %vm341_vm7 = vcmask 31744  }
   0xf   :  { %v212_v15 = vsel %vm210_vm2, %v189_v11, 0  ;;  %v192_v16 = vld [vmem:[%s1680_s8] sm:$0xff]  ;;  %1217 = vmatprep.subr.bf16.mxu0 %v1335_v19  ;;  %v1221_v22 = vpack.c.bf16 %v195_v21, %v194_v18  ;;  %v1506_v50 = vshrl.u32 %v418_v49, 7  ;;  %v1295_v11 = vld [vmem:[%s1683_s11 + $0x10] ss:$8 sps:$4 sm:$0xff]   ;;  %vm662_vm8 = vcmask 1041408  }
  0x10   :  { %v1218_v20 = vpack.c.bf16 %v193_v17, %v192_v16  ;;  %v1106_v23 = vld [vmem:[%s1676_s4] ss:$0 sm:$0xff]  ;;  %v1294_v57 = vld [vmem:[%s1683_s11 + $0x4] ss:$8 sps:$4 sm:$0xff]   ;;  %v1336_v16 = vmov 0   ;;  %vm714_vm9 = vcmask 1042432  }
  0x11   :  { %1166 = vmatmul.mubr.msk.bf16.vlgmr.msra.gmra.mrb[0].mxu0 %vm83_vm1, %v64_v4  ;;  %v196_v31 = vld [vmem:[%s1680_s8 + $0x20] sm:$0xf]  ;;  %v1509_v51 = vsub.s32 0, %v1506_v50  ;;  %v602_v18 = vld [vmem:[%s1686_s14 + $0x8] sm:$0xff]  ;;  %vm710_vm10 = vcmask 154624   ;;  %vm788_vm11 = vcmask 17408  }
  0x12   :  { %1191 = vmatprep.mubr.msk.f32.mxu0 %vm1334_vm0, %v1333_v1  ;;  %1219 = vmatpush3.bf16.msra.mxu0 %v1218_v20  ;;  %v1109_v32 = vld [vmem:[%s1678_s6] ss:$0 sm:$0xff]  ;;  %vm800_vm12 = vcmask 23552   ;;  %vm1085_vm13 = vcmask 150530  }
  0x13   :  { %1220 = vmatprep.subr.bf16.mxu0 %v1335_v19  ;;  %v191_v38 = vld [vmem:[%s1679_s7] sm:$0xf]  ;;  %vm1086_vm14 = vmor %vm1085_vm13, %vm662_vm8 }
  0x14   :  { %v601_v17 = vld [vmem:[%s1686_s14] sm:$0xff] }
  0x15   :  { %v1230_v21 = vpack.c.bf16 %v602_v18, %v601_v17 }
  0x16   :  { %1222 = vmatpush3.bf16.msra.mxu0 %v1221_v22 }
  0x17   :  { %1189 = vmatprep.subr.mxu0 %v1333_v1 }
  0x1a   :  { %1190 = vmatpush3.msk.msra.mxu0 %vm210_vm2, %v196_v31 }
  0x1b   :  { %1223 = vmatprep.subr.bf16.mxu0 %v1335_v19 }
  0xe4   :  { %v121_v7 = vpop.f32.mrb[0].mxu0 }
  0xe5   :  { %v122_v8 = vadd.f32 %v1102_v6, %v121_v7  ;;  %v1167_v9 = vpop.f32.mrb[1].mxu0  ;;  %v197_v6 = vld [vmem:[%s1681_s9] sm:$0x1] }
  0xe6   :  { %v124_v10 = vpop.f32.mrb[2].mxu0 }
  0xe7   :  { %v127_v12 = vmax.f32 %v122_v8, 0.0  ;;  %v1168_v13 = vpop.f32.mrb[3].mxu0  ;;  %v1292_v8 = vld [vmem:[%s1683_s11] ss:$8 sps:$4 sm:$0xff]   ;;  %v1297_v10 = vld [vmem:[%s1683_s11 + $0x14] ss:$8 sps:$4 sm:$0xff]  }
  0xe9   :  { %v131_v14 = vpack.c.bf16 %v127_v12, %v127_v12  ;;  %v598_v12 = vld [vmem:[%s1683_s11 + $0x20] sm:$0x33] }
  0xea   :  { %v1125_v13 = vcombine.high %v598_v12, %v598_v12 }
  0xeb   :  { %1172 = vmatmul.mubr.msk.bf16.vlgmr.msra.gmra.mrb[0].mxu1 %vm144_vm3, %v131_v14  ;;  %v1124_v14 = vcombine.low %v598_v12, %v598_v12 }
  0xec   :  { %1176 = vmatpush3.bf16.msra.mxu1 %v212_v15  ;;  %1177 = vmatprep.mubr.msk.bf16.mxu1 %vm1334_vm0, %v1333_v1 }
  0xed   :  { %1194 = vmatprep.subr.mxu1 %v1333_v1  ;;  %v664_v15 = vsel %vm662_vm8, %v1124_v14, 0 }
 0x1be   :  { %v182_v24 = vpop.f32.mrb[0].mxu1 }
 0x1bf   :  { %v183_v25 = vadd.f32 %v1106_v23, %v182_v24  ;;  %v1173_v26 = vpop.f32.mrb[1].mxu1  ;;  %v605_v24 = vld [vmem:[%s1686_s14 + $0x20] sm:$0xff] }
 0x1c0   :  { %v185_v27 = vpop.f32.mrb[2].mxu1 }
 0x1c1   :  { %v188_v28 = vmax.f32 %v183_v25, 0.0  ;;  %v1174_v29 = vpop.f32.mrb[3].mxu1  ;;  %v606_v25 = vld [vmem:[%s1686_s14 + $0x28] sm:$0xff]  ;;  %v607_v27 = vld [vmem:[%s1686_s14 + $0x30] sm:$0xff] }
 0x1c2   :  { %v1236_v26 = vpack.c.bf16 %v606_v25, %v605_v24 }
 0x1c3   :  { %v199_v30 = vpack.c.bf16 %v188_v28, %v188_v28  ;;  %v608_v28 = vld [vmem:[%s1686_s14 + $0x38] sm:$0xff] }
 0x1c4   :  { %v1239_v29 = vpack.c.bf16 %v608_v28, %v607_v27 }
 0x1c5   :  { %1178 = vmatmul.mubr.msk.bf16.vlgmr.msra.gmra.mrb[4].mxu1 %vm206_vm4, %v199_v30  ;;  %v609_v30 = vld [vmem:[%s1686_s14 + $0x40] sm:$0xff] }
 0x1c6   :  { %1196 = vmatprep.mubr.msk.f32.mxu1 %vm1334_vm0, %v1333_v1  ;;  %1195 = vmatpush3.msk.msra.mxu1 %vm210_vm2, %v191_v38 }
 0x1c7   :  { %1212 = vmatprep.subr.mxu1 %v1333_v1 }
 0x298   :  { %v248_v33 = vpop.f32.mrb[4].mxu1 }
 0x299   :  { %v249_v34 = vadd.f32 %v1109_v32, %v248_v33  ;;  %v1179_v35 = vpop.f32.mrb[5].mxu1  ;;  %v611_v33 = vld [vmem:[%s1686_s14 + $0x50] sm:$0xff] }
 0x29a   :  { %v251_v36 = vpop.f32.mrb[6].mxu1 }
 0x29b   :  { %v1180_v37 = vpop.f32.mrb[7].mxu1  ;;  %1192 = vmatmul.mubr.msk.f32.vlgmr.msra.gmra.mrb[4].mxu0 %vm254_vm5, %v249_v34  ;;  %v613_v36 = vld [vmem:[%s1686_s14 + $0x60] sm:$0xff] }
 0x29c   :  { %1225 = vmatpush3.bf16.msra.mxu0 %v1218_v20  ;;  %1209 = vmatprep.mubr.msk.f32.mxu0 %vm1334_vm0, %v1333_v1  ;;  %v603_v20 = vld [vmem:[%s1686_s14 + $0x10] sm:$0xff]  ;;  %v614_v37 = vld [vmem:[%s1686_s14 + $0x68] sm:$0xff] }
 0x29d   :  { %1226 = vmatprep.subr.bf16.mxu0 %v1335_v19 }
 0x2a0   :  { %1228 = vmatpush3.bf16.msra.mxu0 %v1221_v22  ;;  %v604_v22 = vld [vmem:[%s1686_s14 + $0x18] sm:$0xff] }
 0x2a1   :  { %1207 = vmatprep.subr.mxu0 %v1333_v1  ;;  %v1233_v23 = vpack.c.bf16 %v604_v22, %v603_v20 }
 0x2a4   :  { %1208 = vmatpush3.msk.msra.mxu0 %vm210_vm2, %v196_v31  ;;  %v610_v31 = vld [vmem:[%s1686_s14 + $0x48] sm:$0xff] }
 0x2a5   :  { %1229 = vmatprep.subr.bf16.mxu0 %v1335_v19  ;;  %v1242_v32 = vpack.c.bf16 %v610_v31, %v609_v30 }
 0x36e   :  { %v327_v39 = vpop.f32.mrb[4].mxu0 }
 0x36f   :  { %v332_v40 = vsel %vm331_vm6, %v327_v39, 0.0  ;;  %v1193_v41 = vpop.f32.mrb[5].mxu0  ;;  %v615_v39 = vld [vmem:[%s1686_s14 + $0x70] sm:$0xff] }
 0x370   :  { %v333_v42 = vrot.slane %v332_v40, 4 }
 0x372   :  { %v334_v43 = vadd.f32 %v333_v42, %v332_v40  ;;  %v616_v40 = vld [vmem:[%s1686_s14 + $0x78] sm:$0xff] }
 0x373   :  { %v1251_v41 = vpack.c.bf16 %v616_v40, %v615_v39 }
 0x374   :  { %v335_v44 = vrot.slane %v334_v43, 2 }
 0x376   :  { %v336_v45 = vadd.f32 %v335_v44, %v334_v43 }
 0x378   :  { %v337_v46 = vrot.slane %v336_v45, 1 }
 0x37a   :  { %v338_v47 = vadd.f32 %v337_v46, %v336_v45  ;;  %v1119_v45 = vld [vmem:[%s1682_s10] ss:$0 sm:$0xff] }
 0x37c   :  { %v340_v48 = vmul.f32 0.055555556, %v338_v47 }
 0x37e   :  { %1197 = vmatmul.mubr.msk.f32.vlgmr.msra.gmra.mrb[8].mxu1 %vm341_vm7, %v340_v48 }
 0x37f   :  { %1213 = vmatpush3.msk.msra.mxu1 %vm210_vm2, %v191_v38  ;;  %1214 = vmatprep.mubr.msk.f32.mxu1 %vm1334_vm0, %v1333_v1  ;;  %v1248_v38 = vpack.c.bf16 %v614_v37, %v613_v36  ;;  %v621_v36 = vld [vmem:[%s1688_s16] sm:$0x3] }
 0x380   :  { %669 = vmatprep.subr.bf16.mxu1 %v1294_v57  ;;  %v1063_v39 = vrot.slane %v621_v36, %v1509_v51 }
 0x451   :  { %v414_v52 = vpop.f32.mrb[8].mxu1 }
 0x452   :  { %v421_v53 = vrot.slane %v414_v52, %v1509_v51  ;;  %v1198_v54 = vpop.f32.mrb[9].mxu1  ;;  %v617_v52 = vld [vmem:[%s1686_s14 + $0x80] sm:$0xff] }
 0x454   :  { %v1512_v55 = vsub.f32 %v249_v34, %v421_v53  ;;  %v612_v34 = vld [vmem:[%s1686_s14 + $0x58] sm:$0xff]  ;;  %v618_v53 = vld [vmem:[%s1686_s14 + $0x88] sm:$0xff] }
 0x455   :  { %v1245_v35 = vpack.c.bf16 %v612_v34, %v611_v33  ;;  %v1254_v54 = vpack.c.bf16 %v618_v53, %v617_v52  ;;  %v620_v33 = vld [vmem:[%s1687_s15] sm:$0x1]  ;;  %s1338_s15 = smov [#allocation2]  }
 0x456   :  { %v423_v56 = vmul.f32 %v1512_v55, %v1512_v55  ;;  %s1094_s16 = sshll.u32 %s1338_s15, 4  ;;  %s1095_s16 = int_to_ptr.vmem [resolvable:$true] %s1094_s16 }
 0x457   :  { %s1309_s23 = scalar_lea.vmem %s1095_s16, 64  ;;  %p1314_p1 = scmp.lt.s32.totalorder %s1095_s16, %s1095_s16 }
 0x458   :  { %1210 = vmatmul.mubr.msk.f32.vlgmr.msra.gmra.mrb[6].mxu0 %vm254_vm5, %v423_v56  ;;  %v599_v56 = vld [vmem:[%s1684_s12] sm:$0x3]  ;;  %p1310_p0 = scmp.ne.s32.totalorder %s1095_s16, %s1309_s23  ;;  %p1315_p2 = scmp.lt.s32.totalorder %s1309_s23, %s1309_s23 }
 0x459   :  { %1231 = vmatpush1.bf16.msra.mxu0 %v1230_v21 }
 0x45a   :  { %1232 = vmatprep.subr.bf16.mxu0 %v1335_v19  ;;  %p1316_p3 = por %p1315_p2, %p1314_p1 }
 0x45c   :  { %p1317_p4 = pnand %p1316_p3, %p1310_p0 }
 0x45d   :  { %1234 = vmatpush1.bf16.msra.mxu0 %v1233_v23 }
 0x45e   :  { %1235 = vmatprep.subr.bf16.mxu0 %v1335_v19 }
 0x461   :  { %1237 = vmatpush1.bf16.msra.mxu0 %v1236_v26 }
 0x462   :  { %1238 = vmatprep.subr.bf16.mxu0 %v1335_v19 }
 0x465   :  { %1240 = vmatpush1.bf16.msra.mxu0 %v1239_v29 }
 0x466   :  { %1241 = vmatprep.subr.bf16.mxu0 %v1335_v19 }
 0x469   :  { %1243 = vmatpush1.bf16.msra.mxu0 %v1242_v32 }
 0x46a   :  { %1244 = vmatprep.subr.bf16.mxu0 %v1335_v19 }
 0x46d   :  { %1246 = vmatpush1.bf16.msra.mxu0 %v1245_v35 }
 0x46e   :  { %1247 = vmatprep.subr.bf16.mxu0 %v1335_v19 }
 0x471   :  { %1249 = vmatpush1.bf16.msra.mxu0 %v1248_v38 }
 0x472   :  { %1250 = vmatprep.subr.bf16.mxu0 %v1335_v19 }
 0x475   :  { %1252 = vmatpush1.bf16.msra.mxu0 %v1251_v41 }
 0x476   :  { %1253 = vmatprep.subr.bf16.mxu0 %v1335_v19 }
 0x479   :  { %1255 = vmatpush1.bf16.msra.mxu0 %v1254_v54 }
 0x47a   :  { %754 = vmatprep.subr.mxu0 %v1333_v1 }
 0x52b   :  { %v493_v58 = vpop.f32.mrb[6].mxu0 }
 0x52c   :  { %v497_v59 = vsel %vm331_vm6, %v493_v58, 0.0  ;;  %v1211_v60 = vpop.f32.mrb[7].mxu0  ;;  %v627_v58 = vrot.slane %v599_v56, %v1509_v51 }
 0x52d   :  { %v498_v61 = vrot.slane %v497_v59, 4 }
 0x52f   :  { %v499_v62 = vadd.f32 %v498_v61, %v497_v59 }
 0x531   :  { %v500_v63 = vrot.slane %v499_v62, 2 }
 0x533   :  { %v501_v0 = vadd.f32 %v500_v63, %v499_v62 }
 0x535   :  { %v502_v2 = vrot.slane %v501_v0, 1 }
 0x537   :  { %v503_v3 = vadd.f32 %v502_v2, %v501_v0  ;;  %v600_v2 = vld [vmem:[%s1685_s13] sm:$0x77] }
 0x539   :  { %v504_v4 = vmul.f32 0.055555556, %v503_v3  ;;  %v799_v3 = vcombine.high %v600_v2, %v600_v2 }
 0x53b   :  { %v505_v5 = vadd.f32 1e-05, %v504_v4 }
 0x53d   :  { %1301 = vrsqrt.f32 %v505_v5 }
 0x547   :  { %v1302_v7 = vpop.eup %1301 }
 0x548   :  { %v507_v9 = vmul.f32 %v1302_v7, %v197_v6 }
 0x54a   :  { %1215 = vmatmul.mubr.msk.f32.vlgmr.msra.gmra.mrb[10].mxu1 %vm341_vm7, %v507_v9 }
 0x54b   :  { %670 = vmatpush1.bf16.msra.mxu1 %v1292_v8  ;;  %701 = vmatprep.mubr.bf16.mxu1 %v1336_v16 }
 0x54c   :  { %671 = vmatprep.subr.bf16.mxu1 %v1297_v10 }
 0x54f   :  { %672 = vmatpush1.bf16.msra.mxu1 %v1295_v11 }
 0x550   :  { %1126 = vmatprep.subr.msk.bf16.mxu1 %vm662_vm8, %v1125_v13 }
 0x553   :  { %674 = vmatpush1.bf16.msra.mxu1 %v664_v15 }
 0x554   :  { %1256 = vmatprep.subr.bf16.mxu1 %v1335_v19 }
 0x61d   :  { %v577_v42 = vpop.f32.mrb[10].mxu1 }
 0x61e   :  { %v584_v43 = vrot.slane %v577_v42, %v1509_v51  ;;  %v1216_v44 = vpop.f32.mrb[11].mxu1 }
 0x620   :  { %v585_v46 = vmul.f32 %v584_v43, %v1512_v55  ;;  %v619_v55 = vld [vmem:[%s1686_s14 + $0x90] sm:$0x7] }
 0x621   :  { %1128 = vmatpush1.msk.msra.mxu0 %vm714_vm9, %v619_v55 }
 0x622   :  { %v592_v47 = vadd.f32 %v1119_v45, %v585_v46  ;;  %1130 = vmatprep.subr.msk.mxu0 %vm714_vm9, %v799_v3 }
 0x624   :  { %v593_v48 = vmax.f32 %v592_v47, 0.0  ;;  %v1337_v47 = vmov 1983009808  }
 0x626   :  { %v622_v49 = vpack.c.bf16 %v593_v48, %v593_v48  ;;  %v1078_v48 = vunpack.c.l.s4 %v1337_v47 }
 0x628   :  { %1127 = vmatmul.mubr.msk.bf16.vlgmr.msra.gmra.mrb[12].mxu1 %vm254_vm5, %v622_v49  ;;  %v1079_v49 = vunpack.c.0.s8 %v1078_v48 }
 0x629   :  { %1258 = vmatpush1.bf16.msra.mxu1 %v1230_v21 }
 0x62a   :  { %1259 = vmatprep.subr.bf16.mxu1 %v1335_v19  ;;  %v1082_v53 = vsub.s32 %v1079_v49, %v1506_v50 }
 0x62d   :  { %1261 = vmatpush1.bf16.msra.mxu1 %v1233_v23 }
 0x62e   :  { %1262 = vmatprep.subr.bf16.mxu1 %v1335_v19 }
 0x631   :  { %1264 = vmatpush1.bf16.msra.mxu1 %v1236_v26 }
 0x632   :  { %1265 = vmatprep.subr.bf16.mxu1 %v1335_v19 }
 0x635   :  { %1267 = vmatpush1.bf16.msra.mxu1 %v1239_v29 }
 0x636   :  { %1268 = vmatprep.subr.bf16.mxu1 %v1335_v19 }
 0x639   :  { %1270 = vmatpush1.bf16.msra.mxu1 %v1242_v32 }
 0x63a   :  { %1271 = vmatprep.subr.bf16.mxu1 %v1335_v19 }
 0x63d   :  { %1273 = vmatpush1.bf16.msra.mxu1 %v1245_v35 }
 0x63e   :  { %1274 = vmatprep.subr.bf16.mxu1 %v1335_v19 }
 0x641   :  { %1276 = vmatpush1.bf16.msra.mxu1 %v1248_v38 }
 0x642   :  { %1277 = vmatprep.subr.bf16.mxu1 %v1335_v19 }
 0x645   :  { %1279 = vmatpush1.bf16.msra.mxu1 %v1251_v41 }
 0x646   :  { %1280 = vmatprep.subr.bf16.mxu1 %v1335_v19  ;;  %v630_v19 = vsub.s32 1, %v1506_v50 }
 0x648   :  { %v631_v57 = vrot.slane %v599_v56, %v630_v19  ;;  %v1067_v42 = vrot.slane %v621_v36, %v630_v19 }
 0x649   :  { %1282 = vmatpush1.bf16.msra.mxu1 %v1254_v54 }
 0x64a   :  { %930 = vmatprep.subr.mxu1 %v1333_v1 }
 0x64d   :  { %1133 = vmatpush1.msk.msra.mxu1 %vm714_vm9, %v619_v55 }
 0x6fb   :  { %v703_v59 = vpop.f32.mrb[12].mxu1 }
 0x6fc   :  { %v705_v60 = vpop.f32.mrb[13].mxu1  ;;  %v704_v63 = vadd.f32 %v703_v59, %v627_v58 }
 0x6fd   :  { %v706_v61 = vadd.f32 %v705_v60, %v631_v57  ;;  %v707_v62 = vpop.f32.mrb[14].mxu1 }
 0x6fe   :  { %v708_v0 = vpop.f32.mrb[15].mxu1 }
 0x6ff   :  { %1129 = vmatprep.mubr.msk.f32.mxu0 %vm710_vm10, %v706_v61 }
 0x700   :  { %783 = vmatmul.mubr.f32.vlgmr.msra.gmra.mrb[8].mxu0 %v704_v63 }
 0x701   :  { %872 = vmatprep.mubr.f32.mxu0 %v1333_v1  ;;  %1131 = vmatpush1.msk.msra.mxu0 %vm714_vm9, %v600_v2 }
 0x702   :  { %1135 = vmatprep.subr.msk.mxu0 %vm714_vm9, %v799_v3 }
 0x7d3   :  { %v784_v4 = vpop.f32.mrb[8].mxu0 }
 0x7d4   :  { %v789_v5 = vsel %vm788_vm11, %v784_v4, 0.0  ;;  %v786_v6 = vpop.f32.mrb[9].mxu0 }
 0x7d5   :  { %v790_v7 = vrot.slane %v789_v5, 4 }
 0x7d7   :  { %v791_v8 = vadd.f32 %v790_v7, %v789_v5 }
 0x7d9   :  { %v792_v9 = vrot.slane %v791_v8, 2 }
 0x7db   :  { %v793_v10 = vadd.f32 %v792_v9, %v791_v8 }
 0x7dd   :  { %v794_v11 = vrot.slane %v793_v10, 1 }
 0x7df   :  { %v795_v12 = vadd.f32 %v794_v11, %v793_v10 }
 0x7e1   :  { %v797_v13 = vmul.f32 0.010204081, %v795_v12 }
 0x7e3   :  { %1132 = vmatmul.mubr.msk.f32.vlgmr.msra.gmra.mrb[10].mxu0 %vm800_vm12, %v797_v13 }
 0x7e4   :  { %1136 = vmatpush1.msk.msra.mxu0 %vm714_vm9, %v600_v2  ;;  %1042 = vmatprep.mubr.f32.mxu0 %v1333_v1 }
 0x8b6   :  { %v874_v14 = vpop.f32.mrb[10].mxu0 }
 0x8b7   :  { %v882_v15 = vrot.slane %v874_v14, %v1509_v51  ;;  %v876_v16 = vpop.f32.mrb[11].mxu0 }
 0x8b8   :  { %v886_v17 = vrot.slane %v876_v16, %v1509_v51 }
 0x8b9   :  { %v887_v18 = vsub.f32 %v704_v63, %v882_v15 }
 0x8ba   :  { %v888_v20 = vsub.f32 %v706_v61, %v886_v17 }
 0x8bb   :  { %v889_v22 = vmul.f32 %v887_v18, %v887_v18 }
 0x8bc   :  { %v890_v21 = vmul.f32 %v888_v20, %v888_v20 }
 0x8be   :  { %1134 = vmatprep.mubr.msk.f32.mxu1 %vm710_vm10, %v890_v21 }
 0x8bf   :  { %959 = vmatmul.mubr.f32.vlgmr.msra.gmra.mrb[16].mxu1 %v889_v22 }
 0x992   :  { %v960_v23 = vpop.f32.mrb[16].mxu1 }
 0x993   :  { %v964_v24 = vsel %vm788_vm11, %v960_v23, 0.0  ;;  %v962_v25 = vpop.f32.mrb[17].mxu1 }
 0x994   :  { %v965_v26 = vrot.slane %v964_v24, 4 }
 0x996   :  { %v966_v27 = vadd.f32 %v965_v26, %v964_v24 }
 0x998   :  { %v967_v1 = vrot.slane %v966_v27, 2 }
 0x99a   :  { %v968_v28 = vadd.f32 %v967_v1, %v966_v27 }
 0x99c   :  { %v969_v29 = vrot.slane %v968_v28, 1 }
 0x99e   :  { %v970_v30 = vadd.f32 %v969_v29, %v968_v28 }
 0x9a0   :  { %v971_v31 = vmul.f32 0.010204081, %v970_v30 }
 0x9a2   :  { %v972_v32 = vadd.f32 1e-05, %v971_v31 }
 0x9a4   :  { %1303 = vrsqrt.f32 %v972_v32 }
 0x9ae   :  { %v1304_v34 = vpop.eup %1303 }
 0x9af   :  { %v974_v35 = vmul.f32 %v1304_v34, %v620_v33 }
 0x9b1   :  { %1137 = vmatmul.mubr.msk.f32.vlgmr.msra.gmra.mrb[12].mxu0 %vm800_vm12, %v974_v35 }
 0xa84   :  { %v1044_v37 = vpop.f32.mrb[12].mxu0 }
 0xa85   :  { %v1052_v38 = vrot.slane %v1044_v37, %v1509_v51  ;;  %v1046_v40 = vpop.f32.mrb[13].mxu0 }
 0xa86   :  { %v1056_v41 = vrot.slane %v1046_v40, %v1509_v51 }
 0xa87   :  { %v1057_v43 = vmul.f32 %v1052_v38, %v887_v18 }
 0xa88   :  { %v1058_v44 = vmul.f32 %v1056_v41, %v888_v20 }
 0xa89   :  { %v1070_v45 = vadd.f32 %v1063_v39, %v1057_v43 }
 0xa8a   :  { %v1071_v46 = vadd.f32 %v1067_v42, %v1058_v44 }
 0xa8b   :  { %1305 = vtanh.f32 %v1070_v45 }
 0xa8c   :  { %1307 = vtanh.f32 %v1071_v46 }
 0xa95   :  { %v1306_v52 = vpop.eup %1305 }
 0xa96   :  { %v1308_v54 = vpop.eup %1307 }
 0xa97   :  { %v1076_v51 = vcombine.low %v1306_v52, %v1308_v54 }
 0xa99   :  { %v1083_v55 = vrot.slane %v1076_v51, %v1082_v53 }
 0xa9b   :  { %1087 = vst.msk [vmem:[#allocation2] sm:$0xf] %vm1086_vm14, %v1083_v55 }
 0xa9c   :  { %1320 = shalt.err (!%p1317_p4)
}
 0xa9d   :  { %s1321_s24 = scalar_lea.hbm %s1689_s17, 64 }
 0xa9e   :  { %p1322_p5 = scmp.ne.s32.totalorder %s1689_s17, %s1321_s24  ;;  %p1325_p6 = scmp.lt.u32.totalorder %s1321_s24, %s1689_s17 }
 0xaa0   :  { %p1327_p7 = pnand %p1325_p6, %p1322_p5 }
 0xaa2   :  { %1330 = shalt.err (!%p1327_p7)
}
 0xaa3   :  { %1097 = dma.vmem_to_hbm [thread:$0]  %s1095_s16, 64, %s1689_s17, [#allocation3]  }
 0xaa4   :  { %1331 = dma.done.wait [#allocation3], 64  }
 0xaa5   :  { %1332 = vsyncadd [#allocation3], 4294967232 }
 0xaa6   :  { %1101 = vsyncpa [#allocation3], 1 }

</bundles_post_ra>
